<compile_context>
chip_gen: v6e
topology: v6e:2x2x1
jax: 0.10.0
libtpu: 0.0.40
codegen_flags: <defaults>
</compile_context>

<pallas_src>
import jax
import jax.numpy as jnp
from jax.experimental import pallas as pl
from jax.experimental.pallas import tpu as pltpu


def _critic_kernel(x_ref, w1_ref, b1_ref, w2_ref, b2_ref, w3_ref, b3_ref,
                   o_ref):
    """Fused 3-layer MLP for one batch tile: Linear->ReLU->Linear->ReLU->Linear."""
    # Layer 1: single merged matmul on concat(state, action); bf16 operands,
    # f32 accumulation; bias add + ReLU in f32 (v5e-safe).
    x = x_ref[...].astype(w1_ref.dtype)
    h1 = jnp.dot(x, w1_ref[...], preferred_element_type=jnp.float32) + b1_ref[...]
    h1 = jnp.maximum(h1, 0.0)
    # Layer 2: dominant MXU matmul (hidden x hidden), bf16 operands, f32 acc.
    h2 = (jnp.dot(h1.astype(w2_ref.dtype), w2_ref[...],
                  preferred_element_type=jnp.float32) + b2_ref[...])
    h2 = jnp.maximum(h2, 0.0)
    # Layer 3 (out_features == 1): VPU multiply + lane reduction, all f32.
    o_ref[...] = jnp.sum(h2 * w3_ref[...], axis=-1, keepdims=True) + b3_ref[...]


def _round_up(x, m):
    return ((x + m - 1) // m) * m


def simple_critic_forward(state, action, params, *, block_b=2048,
                          compute_dtype=jnp.bfloat16):
    """Pallas implementation of SimpleCritic.forward(state, action)."""
    w1, b1, w2, b2, w3_row, b3 = params

    state = state.astype(jnp.float32)
    action = action.astype(jnp.float32)
    # Pre-cast the matmul weights to the MXU compute dtype (bf16 by default);
    # biases and the layer-3 row stay f32 (they only feed VPU work).
    w1c = w1.astype(compute_dtype)
    w2c = w2.astype(compute_dtype)
    b1 = b1.astype(jnp.float32)
    b2 = b2.astype(jnp.float32)
    w3_row = w3_row.astype(jnp.float32)
    b3 = b3.astype(jnp.float32)

    B, state_dim = state.shape
    action_dim = action.shape[1]
    in_dim = state_dim + action_dim
    hidden_dim = w2.shape[0]

    # Wrapper-side concat (24 lanes per row — negligible HBM traffic) so the
    # kernel does one merged layer-1 matmul instead of two split dots.
    x = jnp.concatenate([state, action], axis=1)

    # Batch tile: big enough to amortize the ~0.35 us per-grid-step overhead,
    # but split into >= 2 steps whenever B > 256 so v7x's 2 TensorCores both
    # get work via the "parallel" grid axis.
    min_split_batch = 256
    n_tiles = max(pl.cdiv(B, block_b), 2 if B > min_split_batch else 1)
    TB = _round_up(max(pl.cdiv(B, n_tiles), 1), 8)
    Bp = _round_up(B, TB)
    if Bp != B:
        x = jnp.pad(x, ((0, Bp - B), (0, 0)))

    grid = (Bp // TB,)

    def resident(shape):
        # Whole-array block, same index every grid step -> stays VMEM-resident.
        return pl.BlockSpec(shape, lambda i: (0, 0))

    flops = 2 * Bp * (in_dim * hidden_dim + hidden_dim * hidden_dim + hidden_dim)
    weight_bytes = (2 * (in_dim * hidden_dim + hidden_dim * hidden_dim)   # bf16
                    + 4 * (hidden_dim + hidden_dim + hidden_dim + 1))     # f32
    bytes_accessed = 4 * Bp * (in_dim + 1) + weight_bytes

    out = pl.pallas_call(
        _critic_kernel,
        out_shape=jax.ShapeDtypeStruct((Bp, 1), jnp.float32),
        grid=grid,
        in_specs=[
            pl.BlockSpec((TB, in_dim), lambda i: (i, 0)),      # x tile
            resident((in_dim, hidden_dim)),                    # W1 (merged, bf16)
            resident((1, hidden_dim)),                         # b1
            resident((hidden_dim, hidden_dim)),                # W2 (bf16)
            resident((1, hidden_dim)),                         # b2
            resident((1, hidden_dim)),                         # W3 as a row (f32)
            resident((1, 1)),                                  # b3
        ],
        out_specs=pl.BlockSpec((TB, 1), lambda i: (i, 0)),
        compiler_params=pltpu.CompilerParams(
            dimension_semantics=("parallel",),
        ),
        cost_estimate=pl.CostEstimate(
            flops=flops, transcendentals=0, bytes_accessed=bytes_accessed),
    )(x, w1c, b1, w2c, b2, w3_row, b3)

    return out[:B]


def init_params(key, state_dim, action_dim, hidden_dim=256):
    """Deterministic synthetic init (PyTorch-Linear-style uniform bounds).

    Weights are stored pre-transposed as (in, out); W1 is already the merged
    (state_dim + action_dim, hidden) matrix; W3 is stored as a (1, hidden) row.
    All parameters are f32 masters; the wrapper casts W1/W2 to bf16.
    """
    in_dim = state_dim + action_dim
    ks = jax.random.split(key, 6)

    def lin(kw, kb, fan_in, fan_out):
        bound = 1.0 / jnp.sqrt(fan_in)
        w = jax.random.uniform(kw, (fan_in, fan_out), jnp.float32, -bound, bound)
        b = jax.random.uniform(kb, (1, fan_out), jnp.float32, -bound, bound)
        return w, b

    w1, b1 = lin(ks[0], ks[1], in_dim, hidden_dim)
    w2, b2 = lin(ks[2], ks[3], hidden_dim, hidden_dim)
    w3, b3 = lin(ks[4], ks[5], hidden_dim, 1)
    w3_row = w3.T          # (1, hidden_dim)
    return (w1, b1, w2, b2, w3_row, b3)


def _reference_matched(state, action, params, compute_dtype=jnp.bfloat16):
    """Pure-JAX reference with the SAME bf16-operand / f32-accumulate math."""
    w1, b1, w2, b2, w3_row, b3 = params
    x = jnp.concatenate([state, action], axis=1)
    h1 = jnp.maximum(
        jnp.dot(x.astype(compute_dtype), w1.astype(compute_dtype),
                preferred_element_type=jnp.float32) + b1, 0.0)
    h2 = jnp.maximum(
        jnp.dot(h1.astype(compute_dtype), w2.astype(compute_dtype),
                preferred_element_type=jnp.float32) + b2, 0.0)
    return jnp.sum(h2 * w3_row, axis=-1, keepdims=True) + b3


def _reference_f32(state, action, params):
    """Full-f32 reference matching the original PyTorch module."""
    w1, b1, w2, b2, w3_row, b3 = params
    x = jnp.concatenate([state, action], axis=1)
    h1 = jnp.maximum(x @ w1 + b1, 0.0)
    h2 = jnp.maximum(h1 @ w2 + b2, 0.0)
    return h2 @ w3_row.T + b3


if __name__ == "__main__":
    state_dim, action_dim, hidden_dim = 16, 8, 256

    key = jax.random.PRNGKey(0)
    k_state, k_action, k_params, k_state2, k_action2 = jax.random.split(key, 5)
    params = init_params(k_params, state_dim, action_dim, hidden_dim)

    # Small-batch check (MADDPG-style per-update batch), single grid step.
    batch = 8
    state = jax.random.normal(k_state, (batch, state_dim), jnp.float32)
    action = jax.random.normal(k_action, (batch, action_dim), jnp.float32)
    out = simple_critic_forward(state, action, params)
    jax.block_until_ready(out)
    assert out.shape == (batch, 1)
    ref_m = _reference_matched(state, action, params)
    assert jnp.allclose(out, ref_m, atol=1e-3, rtol=1e-3)
    ref_f = _reference_f32(state, action, params)
    assert jnp.allclose(out, ref_f, atol=2e-2, rtol=2e-2)   # bf16-dot vs f32 module

    # Larger batch: >1 grid tile (v7x 2-TC split path) + tail-row padding.
    batch2 = 300
    state2 = jax.random.normal(k_state2, (batch2, state_dim), jnp.float32)
    action2 = jax.random.normal(k_action2, (batch2, action_dim), jnp.float32)
    out2 = simple_critic_forward(state2, action2, params)
    jax.block_until_ready(out2)
    assert out2.shape == (batch2, 1)
    ref2_m = _reference_matched(state2, action2, params)
    assert jnp.allclose(out2, ref2_m, atol=1e-3, rtol=1e-3)
    ref2_f = _reference_f32(state2, action2, params)
    assert jnp.allclose(out2, ref2_f, atol=2e-2, rtol=2e-2)

    print("KERNEL_OK")
</pallas_src>

<mosaic_0001>
module attributes {stable_mosaic.version = 11 : i64} {
  func.func @_critic_kernel(%arg0: i32, %arg1: memref<8x24xf32, #tpu.memory_space<vmem>>, %arg2: memref<24x256xbf16, #tpu.memory_space<vmem>>, %arg3: memref<1x256xf32, #tpu.memory_space<vmem>>, %arg4: memref<256x256xbf16, #tpu.memory_space<vmem>>, %arg5: memref<1x256xf32, #tpu.memory_space<vmem>>, %arg6: memref<1x256xf32, #tpu.memory_space<vmem>>, %arg7: memref<1x1xf32, #tpu.memory_space<vmem>>, %arg8: memref<8x1xf32, #tpu.memory_space<vmem>>) attributes {dimension_semantics = [#tpu.dimension_semantics<parallel>], iteration_bounds = array<i64: 1>, scalar_prefetch = 0 : i64, scratch_operands = 0 : i64, tpu.core_type = #tpu.core_type<tc>, window_params = [{transform_indices = @transform_0, window_bounds = array<i64: 8, 24>}, {pipeline_mode = #tpu.pipeline_mode<synchronous>, transform_indices = @transform_1, window_bounds = array<i64: 24, 256>}, {pipeline_mode = #tpu.pipeline_mode<synchronous>, transform_indices = @transform_2, window_bounds = array<i64: 1, 256>}, {pipeline_mode = #tpu.pipeline_mode<synchronous>, transform_indices = @transform_3, window_bounds = array<i64: 256, 256>}, {pipeline_mode = #tpu.pipeline_mode<synchronous>, transform_indices = @transform_4, window_bounds = array<i64: 1, 256>}, {pipeline_mode = #tpu.pipeline_mode<synchronous>, transform_indices = @transform_5, window_bounds = array<i64: 1, 256>}, {pipeline_mode = #tpu.pipeline_mode<synchronous>, transform_indices = @transform_6, window_bounds = array<i64: 1, 1>}, {transform_indices = @transform_7, window_bounds = array<i64: 8, 1>}]} {
    %c0 = arith.constant 0 : index
    %c0_0 = arith.constant 0 : index
    %0 = vector.load %arg1[%c0, %c0_0] : memref<8x24xf32, #tpu.memory_space<vmem>>, vector<8x24xf32>
    %1 = arith.truncf %0 : vector<8x24xf32> to vector<8x24xbf16>
    %c0_1 = arith.constant 0 : index
    %c0_2 = arith.constant 0 : index
    %2 = vector.load %arg2[%c0_1, %c0_2] : memref<24x256xbf16, #tpu.memory_space<vmem>>, vector<24x256xbf16>
    %cst = arith.constant dense<0.000000e+00> : vector<8x256xf32>
    %3 = tpu.matmul %1, %2, %cst {dimension_numbers = #tpu.dot_dimension_numbers<[1], [0], [0], [1], [0, 0, 1, 1], [], []>} : vector<8x24xbf16>, vector<24x256xbf16>, vector<8x256xf32> -> vector<8x256xf32>
    %c0_3 = arith.constant 0 : index
    %c0_4 = arith.constant 0 : index
    %4 = vector.load %arg3[%c0_3, %c0_4] : memref<1x256xf32, #tpu.memory_space<vmem>>, vector<1x256xf32>
    %5 = vector.broadcast %4 : vector<1x256xf32> to vector<8x256xf32>
    %6 = arith.addf %3, %5 : vector<8x256xf32>
    %cst_5 = arith.constant 0.000000e+00 : f32
    %7 = vector.broadcast %cst_5 : f32 to vector<8x256xf32>
    %8 = arith.maximumf %6, %7 : vector<8x256xf32>
    %9 = arith.truncf %8 : vector<8x256xf32> to vector<8x256xbf16>
    %c0_6 = arith.constant 0 : index
    %c0_7 = arith.constant 0 : index
    %10 = vector.load %arg4[%c0_6, %c0_7] : memref<256x256xbf16, #tpu.memory_space<vmem>>, vector<256x256xbf16>
    %cst_8 = arith.constant dense<0.000000e+00> : vector<8x256xf32>
    %11 = tpu.matmul %9, %10, %cst_8 {dimension_numbers = #tpu.dot_dimension_numbers<[1], [0], [0], [1], [0, 0, 1, 1], [], []>} : vector<8x256xbf16>, vector<256x256xbf16>, vector<8x256xf32> -> vector<8x256xf32>
    %c0_9 = arith.constant 0 : index
    %c0_10 = arith.constant 0 : index
    %12 = vector.load %arg5[%c0_9, %c0_10] : memref<1x256xf32, #tpu.memory_space<vmem>>, vector<1x256xf32>
    %13 = vector.broadcast %12 : vector<1x256xf32> to vector<8x256xf32>
    %14 = arith.addf %11, %13 : vector<8x256xf32>
    %cst_11 = arith.constant 0.000000e+00 : f32
    %15 = vector.broadcast %cst_11 : f32 to vector<8x256xf32>
    %16 = arith.maximumf %14, %15 : vector<8x256xf32>
    %c0_12 = arith.constant 0 : index
    %c0_13 = arith.constant 0 : index
    %17 = vector.load %arg6[%c0_12, %c0_13] : memref<1x256xf32, #tpu.memory_space<vmem>>, vector<1x256xf32>
    %18 = vector.broadcast %17 : vector<1x256xf32> to vector<8x256xf32>
    %19 = arith.mulf %16, %18 : vector<8x256xf32>
    %cst_14 = arith.constant dense<0.000000e+00> : vector<8xf32>
    %20 = vector.multi_reduction <add>, %19, %cst_14 [1] : vector<8x256xf32> to vector<8xf32>
    %21 = vector.shape_cast %20 : vector<8xf32> to vector<8x1xf32>
    %c0_15 = arith.constant 0 : index
    %c0_16 = arith.constant 0 : index
    %22 = vector.load %arg7[%c0_15, %c0_16] : memref<1x1xf32, #tpu.memory_space<vmem>>, vector<1x1xf32>
    %23 = vector.broadcast %22 : vector<1x1xf32> to vector<8x1xf32>
    %24 = arith.addf %21, %23 : vector<8x1xf32>
    %c0_17 = arith.constant 0 : index
    %c0_18 = arith.constant 0 : index
    %25 = vector.load %arg8[%c0_17, %c0_18] : memref<8x1xf32, #tpu.memory_space<vmem>>, vector<8x1xf32>
    tpu.vector_store %arg8[%c0_17, %c0_18], %24 {strides = array<i32>} : memref<8x1xf32, #tpu.memory_space<vmem>>, vector<8x1xf32>,
    return
  }
  func.func @transform_0(%arg0: i32) -> (i32, i32) {
    %c0_i32 = arith.constant 0 : i32
    %c0_i32_0 = arith.constant 0 : i32
    return %arg0, %c0_i32 : i32, i32
  }
  func.func @transform_1(%arg0: i32) -> (i32, i32) {
    %c0_i32 = arith.constant 0 : i32
    %c0_i32_0 = arith.constant 0 : i32
    %c0_i32_1 = arith.constant 0 : i32
    return %c0_i32, %c0_i32_0 : i32, i32
  }
  func.func @transform_2(%arg0: i32) -> (i32, i32) {
    %c0_i32 = arith.constant 0 : i32
    %c0_i32_0 = arith.constant 0 : i32
    %c0_i32_1 = arith.constant 0 : i32
    return %c0_i32, %c0_i32_0 : i32, i32
  }
  func.func @transform_3(%arg0: i32) -> (i32, i32) {
    %c0_i32 = arith.constant 0 : i32
    %c0_i32_0 = arith.constant 0 : i32
    %c0_i32_1 = arith.constant 0 : i32
    return %c0_i32, %c0_i32_0 : i32, i32
  }
  func.func @transform_4(%arg0: i32) -> (i32, i32) {
    %c0_i32 = arith.constant 0 : i32
    %c0_i32_0 = arith.constant 0 : i32
    %c0_i32_1 = arith.constant 0 : i32
    return %c0_i32, %c0_i32_0 : i32, i32
  }
  func.func @transform_5(%arg0: i32) -> (i32, i32) {
    %c0_i32 = arith.constant 0 : i32
    %c0_i32_0 = arith.constant 0 : i32
    %c0_i32_1 = arith.constant 0 : i32
    return %c0_i32, %c0_i32_0 : i32, i32
  }
  func.func @transform_6(%arg0: i32) -> (i32, i32) {
    %c0_i32 = arith.constant 0 : i32
    %c0_i32_0 = arith.constant 0 : i32
    %c0_i32_1 = arith.constant 0 : i32
    return %c0_i32, %c0_i32_0 : i32, i32
  }
  func.func @transform_7(%arg0: i32) -> (i32, i32) {
    %c0_i32 = arith.constant 0 : i32
    %c0_i32_0 = arith.constant 0 : i32
    return %arg0, %c0_i32 : i32, i32
  }
}

</mosaic_0001>

<bundles_post_ra>
// kernel: tpu_custom_call.1
= control target key start
LH: loop header
LB: loop body
LE: loop exit
PB: predicated region body
PF: predicated region fallthrough
CT: control target
= control target key end

     0   :  { %s668_s0 = inlined_call_operand.hbm [shape: f32[8,24], index: 0, kind: input, shape index: {}]   ;;  %s669_s1 = inlined_call_operand.hbm [shape: bf16[24,256], index: 1, kind: input, shape index: {}]   ;;  %s670_s2 = inlined_call_operand.vmem [shape: f32[1,256], index: 2, kind: input, shape index: {}]   ;;  %s671_s3 = inlined_call_operand.hbm [shape: bf16[256,256], index: 3, kind: input, shape index: {}]   ;;  %s672_s4 = inlined_call_operand.vmem [shape: f32[1,256], index: 4, kind: input, shape index: {}]   ;;  %s673_s5 = inlined_call_operand.vmem [shape: f32[1,256], index: 5, kind: input, shape index: {}]   ;;  %s674_s6 = inlined_call_operand.<no memory space> [shape: f32[1,1], index: 6, kind: input, shape index: {}]   ;;  %s675_s7 = inlined_call_operand.vmem [shape: f32[8,1], index: 7, kind: output, shape index: {}]  }
   0x1   :  { %v12_v0 = vstv %s674_s6 }
   0x2   :  { %13 = vst [vmem:[#allocation2] sm:$0x1] %v12_v0 }
   0x3   :  { %14 = vsyncpa [#allocation4], 0 }
   0x4   :  { %15 = vsyncpa [#allocation6], 0  ;;  %s598_s26 = smov [#allocation5]  }
   0x5   :  { %s31_s27 = sshll.u32 %s598_s26, 4  ;;  %s32_s27 = int_to_ptr.vmem [resolvable:$true] %s31_s27 }
   0x6   :  { %s542_s28 = scalar_lea.vmem %s32_s27, 384  ;;  %p547_p1 = scmp.lt.s32.totalorder %s32_s27, %s32_s27 }
   0x7   :  { %p543_p0 = scmp.ne.s32.totalorder %s32_s27, %s542_s28  ;;  %p548_p2 = scmp.lt.s32.totalorder %s542_s28, %s542_s28 }
   0x9   :  { %p549_p3 = por %p548_p2, %p547_p1 }
   0xb   :  { %p550_p4 = pnand %p549_p3, %p543_p0 }
   0xd   :  { %553 = shalt.err (!%p550_p4)
}
   0xe   :  { %s599_s29 = smov 128   ;;  %s600_s30 = smov 8  }
   0xf   :  { %37 = dma.hbm_to_vmem [thread:$0]  %s669_s1, 384, %s32_s27, [#allocation6], %s599_s29, %s599_s29, %s600_s30  }
  0x10   :  { %s601_s6 = smov [#allocation3]   ;;  %s602_s11 = smov [#allocation7]  }
  0x11   :  { %s22_s10 = sshll.u32 %s601_s6, 4  ;;  %s45_s12 = sshll.u32 %s602_s11, 4  ;;  %s23_s10 = int_to_ptr.vmem [resolvable:$true] %s22_s10  ;;  %s46_s12 = int_to_ptr.vmem [resolvable:$true] %s45_s12 }
  0x12   :  { %s562_s13 = scalar_lea.vmem %s23_s10, 128  ;;  %p567_p6 = scmp.lt.s32.totalorder %s23_s10, %s23_s10 }
  0x13   :  { %p563_p5 = scmp.ne.s32.totalorder %s23_s10, %s562_s13  ;;  %p568_p7 = scmp.lt.s32.totalorder %s562_s13, %s562_s13 }
  0x15   :  { %p569_p8 = por %p568_p7, %p567_p6 }
  0x17   :  { %p570_p9 = pnand %p569_p8, %p563_p5 }
  0x19   :  { %573 = shalt.err (!%p570_p9)
}
  0x1a   :  { %25 = dma.hbm_to_vmem [thread:$0]  %s668_s0, 128, %s23_s10, [#allocation4]  }
  0x1b   :  { %s582_s16 = scalar_lea.vmem %s46_s12, 4096  ;;  %p587_p11 = scmp.lt.s32.totalorder %s46_s12, %s46_s12 }
  0x1c   :  { %p583_p10 = scmp.ne.s32.totalorder %s46_s12, %s582_s16  ;;  %p588_p12 = scmp.lt.s32.totalorder %s582_s16, %s582_s16 }
  0x1e   :  { %p589_p13 = por %p588_p12, %p587_p11 }
  0x20   :  { %p590_p0 = pnand %p589_p13, %p583_p10 }
  0x22   :  { %593 = shalt.err (!%p590_p0)
}
  0x23   :  { %51 = dma.hbm_to_vmem [thread:$0]  %s671_s3, 4096, %s46_s12, [#allocation6], %s599_s29, %s599_s29, %s600_s30  }
  0x24   :  { %594 = dma.done.wait [#allocation4], 128  }
  0x25   :  { %595 = vsyncadd [#allocation4], 4294967168 }
  0x26   :  { %596 = dma.done.wait [#allocation6], 4480  }
  0x27   :  { %597 = vsyncadd [#allocation6], 4294962816  ;;  %v603_v1 = vmov 0   ;;  %v72_v2 = vld [vmem:[#allocation5 + $0x10] sm:$0xff]  ;;  %vm104_vm0 = vcmask 1043456   ;;  %v68_v10 = vld [vmem:[#allocation3] sm:$0xff]  ;;  %v75_v42 = vlaneseq }
  0x28   :  { %143 = vmatprep.mubr.bf16.mxu0 %v603_v1  ;;  %v439_v3 = vcombine.high %v72_v2, %v72_v2  ;;  %v438_v4 = vcombine.low %v72_v2, %v72_v2  ;;  %v483_v5 = vld [vmem:[#allocation5 + $0x4] ss:$8 sps:$4 sm:$0xff]   ;;  %v485_v6 = vld [vmem:[#allocation5] ss:$8 sps:$4 sm:$0xff]   ;;  %v69_v14 = vpack.c.bf16 %v68_v10, %v68_v10  ;;  %vm100_vm1 = vcmask 195584  }
  0x29   :  { %v486_v7 = vld [vmem:[#allocation7 + $0x74] ss:$8 sps:$4 sm:$0xff]   ;;  %v488_v9 = vld [vmem:[#allocation7 + $0x70] ss:$8 sps:$4 sm:$0xff]   ;;  %v489_v11 = vld [vmem:[#allocation7 + $0x64] ss:$8 sps:$4 sm:$0xff]  }
  0x2a   :  { %440 = vmatprep.subr.msk.bf16.mxu0 %vm104_vm0, %v439_v3  ;;  %v106_v8 = vsel %vm104_vm0, %v438_v4, 0  ;;  %360 = vmatprep.subr.bf16.mxu1 %v486_v7  ;;  %v491_v12 = vld [vmem:[#allocation7 + $0x60] ss:$8 sps:$4 sm:$0xff]   ;;  %v492_v13 = vld [vmem:[#allocation7 + $0x54] ss:$8 sps:$4 sm:$0xff]   ;;  %v76_v43 = vshrl.u32 %v75_v42, 7 }
  0x2b   :  { %124 = vmatpush1.bf16.msra.mxu0 %v106_v8  ;;  %361 = vmatpush1.bf16.msra.mxu1 %v488_v9  ;;  %v494_v15 = vld [vmem:[#allocation7 + $0x50] ss:$8 sps:$4 sm:$0xff]   ;;  %v495_v16 = vld [vmem:[#allocation7 + $0x44] ss:$8 sps:$4 sm:$0xff]   ;;  %v497_v17 = vld [vmem:[#allocation7 + $0x40] ss:$8 sps:$4 sm:$0xff]  }
  0x2c   :  { %125 = vmatprep.subr.bf16.mxu0 %v483_v5  ;;  %362 = vmatprep.subr.bf16.mxu1 %v489_v11  ;;  %v498_v18 = vld [vmem:[#allocation7 + $0x34] ss:$8 sps:$4 sm:$0xff]   ;;  %v500_v19 = vld [vmem:[#allocation7 + $0x30] ss:$8 sps:$4 sm:$0xff]   ;;  %v501_v20 = vld [vmem:[#allocation7 + $0x24] ss:$8 sps:$4 sm:$0xff]  }
  0x2d   :  { %v503_v21 = vld [vmem:[#allocation7 + $0x20] ss:$8 sps:$4 sm:$0xff]   ;;  %v504_v22 = vld [vmem:[#allocation7 + $0x14] ss:$8 sps:$4 sm:$0xff]   ;;  %v506_v23 = vld [vmem:[#allocation7 + $0x10] ss:$8 sps:$4 sm:$0xff]  }
  0x2e   :  { %v507_v24 = vld [vmem:[#allocation7 + $0x4] ss:$8 sps:$4 sm:$0xff]   ;;  %v509_v25 = vld [vmem:[#allocation7] ss:$8 sps:$4 sm:$0xff]   ;;  %v510_v26 = vld [vmem:[#allocation7 + $0xf4] ss:$8 sps:$4 sm:$0xff]  }
  0x2f   :  { %126 = vmatpush1.bf16.msra.mxu0 %v485_v6  ;;  %363 = vmatpush1.bf16.msra.mxu1 %v491_v12  ;;  %v512_v27 = vld [vmem:[#allocation7 + $0xf0] ss:$8 sps:$4 sm:$0xff]   ;;  %v513_v28 = vld [vmem:[#allocation7 + $0xe4] ss:$8 sps:$4 sm:$0xff]   ;;  %v515_v29 = vld [vmem:[#allocation7 + $0xe0] ss:$8 sps:$4 sm:$0xff]  }
  0x30   :  { %364 = vmatprep.subr.bf16.mxu1 %v492_v13  ;;  %v516_v30 = vld [vmem:[#allocation7 + $0xd4] ss:$8 sps:$4 sm:$0xff]   ;;  %v518_v31 = vld [vmem:[#allocation7 + $0xd0] ss:$8 sps:$4 sm:$0xff]   ;;  %v519_v32 = vld [vmem:[#allocation7 + $0xc4] ss:$8 sps:$4 sm:$0xff]  }
  0x31   :  { %v521_v33 = vld [vmem:[#allocation7 + $0xc0] ss:$8 sps:$4 sm:$0xff]   ;;  %v522_v34 = vld [vmem:[#allocation7 + $0xb4] ss:$8 sps:$4 sm:$0xff]   ;;  %v524_v35 = vld [vmem:[#allocation7 + $0xb0] ss:$8 sps:$4 sm:$0xff]  }
  0x32   :  { %441 = vmatmul.mubr.msk.bf16.vlgmr.msra.gmra.mxu0 %vm100_vm1, %v69_v14  ;;  %v525_v36 = vld [vmem:[#allocation7 + $0xa4] ss:$8 sps:$4 sm:$0xff]   ;;  %v527_v37 = vld [vmem:[#allocation7 + $0xa0] ss:$8 sps:$4 sm:$0xff]   ;;  %v528_v38 = vld [vmem:[#allocation7 + $0x94] ss:$8 sps:$4 sm:$0xff]  }
  0x33   :  { %365 = vmatpush1.bf16.msra.mxu1 %v494_v15  ;;  %v530_v39 = vld [vmem:[#allocation7 + $0x90] ss:$8 sps:$4 sm:$0xff]   ;;  %v531_v40 = vld [vmem:[#allocation7 + $0x84] ss:$8 sps:$4 sm:$0xff]   ;;  %v533_v41 = vld [vmem:[#allocation7 + $0x80] ss:$8 sps:$4 sm:$0xff]  }
  0x34   :  { %366 = vmatprep.subr.bf16.mxu1 %v495_v16  ;;  %v77_v44 = vsub.s32 0, %v76_v43  ;;  %v73_v45 = vld [vmem:[%s670_s2] sm:$0x3]  ;;  %v81_v46 = vsub.s32 1, %v76_v43  ;;  %vm428_vm2 = vcmask 7168  }
  0x35   :  { %v188_v59 = vld [vmem:[%s672_s4] sm:$0x3] }
  0x36   :  { %v78_v47 = vrot.slane %v73_v45, %v77_v44  ;;  %v82_v48 = vrot.slane %v73_v45, %v81_v46  ;;  %v193_v60 = vrot.slane %v188_v59, %v77_v44  ;;  %v197_v61 = vrot.slane %v188_v59, %v81_v46  ;;  %v403_v63 = vld [vmem:[%s673_s5] sm:$0x3] }
  0x37   :  { %367 = vmatpush1.bf16.msra.mxu1 %v497_v17  ;;  %v408_v4 = vrot.slane %v403_v63, %v77_v44  ;;  %v412_v5 = vrot.slane %v403_v63, %v81_v46  ;;  %v474_v12 = vld [vmem:[#allocation2] ss:$0 sm:$0xff] }
  0x38   :  { %368 = vmatprep.subr.bf16.mxu1 %v498_v18 }
  0x3b   :  { %369 = vmatpush1.bf16.msra.mxu1 %v500_v19 }
  0x3c   :  { %370 = vmatprep.subr.bf16.mxu1 %v501_v20 }
  0x3f   :  { %371 = vmatpush1.bf16.msra.mxu1 %v503_v21 }
  0x40   :  { %372 = vmatprep.subr.bf16.mxu1 %v504_v22 }
  0x43   :  { %373 = vmatpush1.bf16.msra.mxu1 %v506_v23 }
  0x44   :  { %374 = vmatprep.subr.bf16.mxu1 %v507_v24 }
  0x47   :  { %375 = vmatpush1.bf16.msra.mxu1 %v509_v25 }
  0x48   :  { %376 = vmatprep.subr.bf16.mxu1 %v510_v26 }
  0x4b   :  { %377 = vmatpush2.bf16.msra.mxu1 %v512_v27 }
  0x4c   :  { %378 = vmatprep.subr.bf16.mxu1 %v513_v28 }
  0x4f   :  { %379 = vmatpush2.bf16.msra.mxu1 %v515_v29 }
  0x50   :  { %380 = vmatprep.subr.bf16.mxu1 %v516_v30 }
  0x53   :  { %381 = vmatpush2.bf16.msra.mxu1 %v518_v31 }
  0x54   :  { %382 = vmatprep.subr.bf16.mxu1 %v519_v32 }
  0x57   :  { %383 = vmatpush2.bf16.msra.mxu1 %v521_v33 }
  0x58   :  { %384 = vmatprep.subr.bf16.mxu1 %v522_v34 }
  0x5b   :  { %385 = vmatpush2.bf16.msra.mxu1 %v524_v35 }
  0x5c   :  { %386 = vmatprep.subr.bf16.mxu1 %v525_v36 }
  0x5f   :  { %387 = vmatpush2.bf16.msra.mxu1 %v527_v37 }
  0x60   :  { %388 = vmatprep.subr.bf16.mxu1 %v528_v38 }
  0x63   :  { %389 = vmatpush2.bf16.msra.mxu1 %v530_v39 }
  0x64   :  { %390 = vmatprep.subr.bf16.mxu1 %v531_v40 }
  0x67   :  { %391 = vmatpush2.bf16.msra.mxu1 %v533_v41 }
  0xf2   :  { %v145_v49 = vpop.f32.mrf.mxu0 }
  0xf3   :  { %v146_v50 = vadd.f32 %v145_v49, %v78_v47 }
  0xf4   :  { %v147_v51 = vpop.f32.mrf.mxu0 }
  0xf5   :  { %v148_v52 = vadd.f32 %v147_v51, %v82_v48  ;;  %v152_v53 = vmax.f32 %v146_v50, 0.0 }
  0xf6   :  { %v149_v54 = vpop.f32.mrf.mxu0 }
  0xf7   :  { %v153_v55 = vmax.f32 %v148_v52, 0.0  ;;  %v154_v58 = vpack.c.bf16 %v152_v53, %v152_v53 }
  0xf8   :  { %v150_v56 = vpop.f32.mrf.mxu0 }
  0xf9   :  { %v155_v57 = vpack.c.bf16 %v153_v55, %v153_v55 }
  0xfb   :  { %392 = vmatprep.mubr.bf16.mxu1 %v155_v57 }
  0xfc   :  { %393 = vmatmul.mubr.bf16.vlgmr.msra.gmra.mxu1 %v154_v58 }
 0x1bc   :  { %v394_v62 = vpop.f32.mrf.mxu1 }
 0x1bd   :  { %v395_v0 = vadd.f32 %v394_v62, %v193_v60 }
 0x1be   :  { %v396_v1 = vpop.f32.mrf.mxu1 }
 0x1bf   :  { %v401_v2 = vmax.f32 %v395_v0, 0.0  ;;  %v397_v3 = vadd.f32 %v396_v1, %v197_v61 }
 0x1c0   :  { %v398_v6 = vpop.f32.mrf.mxu1 }
 0x1c1   :  { %v402_v7 = vmax.f32 %v397_v3, 0.0  ;;  %v415_v9 = vmul.f32 %v408_v4, %v401_v2 }
 0x1c2   :  { %v399_v8 = vpop.f32.mrf.mxu1 }
 0x1c3   :  { %v416_v10 = vmul.f32 %v412_v5, %v402_v7 }
 0x1c5   :  { %v417_v11 = vadd.f32 %v416_v10, %v415_v9 }
 0x1c7   :  { %418 = vadd.xlane.f32.xlu0 %v417_v11 }
 0x250   :  { %v419_v13 = vpop.xlane.xlu0 %418 }
 0x251   :  { %v427_v14 = vadd.f32 %v474_v12, %v419_v13 }
 0x253   :  { %429 = vst.msk [vmem:[%s675_s7] sm:$0xff] %vm428_vm2, %v427_v14 }
 0x254   :  { %434 = vsyncpa [#allocation4], 1 }
 0x255   :  { %435 = vsyncpa [#allocation6], 1 }

</bundles_post_ra>
